<compile_context>
chip_gen: v7x
topology: tpu7x:2x2x1
jax: 0.10.0
libtpu: 0.0.40
codegen_flags: <defaults>
</compile_context>

<pallas_src>
import functools

import jax
import jax.numpy as jnp
from jax.experimental import pallas as pl
from jax.experimental.pallas import tpu as pltpu

LANE = 128
SUBLANE = 8


def _round_up(v, m):
    return (v + m - 1) // m * m


def _gelu_exact(x):
    # PyTorch nn.GELU() default: exact erf-based GELU.
    return 0.5 * x * (1.0 + jax.lax.erf(x * (1.0 / jnp.sqrt(2.0).astype(x.dtype))))


def actor_kernel(x_ref, w1_ref, b1_ref, w2_ref, b2_ref, w3_ref, b3_ref, out_ref,
                 *, n_actions):
    x = x_ref[...]  # (TB, obs) f32

    # fc1 + GELU  (bf16 operands on MXU, f32 accumulation)
    h = jnp.dot(x.astype(jnp.bfloat16), w1_ref[...],
                preferred_element_type=jnp.float32) + b1_ref[...]
    h = _gelu_exact(h)

    # fc2 + GELU
    h = jnp.dot(h.astype(jnp.bfloat16), w2_ref[...],
                preferred_element_type=jnp.float32) + b2_ref[...]
    h = _gelu_exact(h)

    # fc3 (logits over a lane-padded action dim)
    logits = jnp.dot(h.astype(jnp.bfloat16), w3_ref[...],
                     preferred_element_type=jnp.float32) + b3_ref[...]

    # Mask padded action lanes so they contribute nothing to the softmax.
    lane_id = jax.lax.broadcasted_iota(jnp.int32, logits.shape, 1)
    logits = jnp.where(lane_id < n_actions, logits, jnp.float32(-1e30))

    # Numerically-stable softmax over the last dim; divide goes to the EUP.
    m = jnp.max(logits, axis=-1, keepdims=True)
    e = jnp.exp(logits - m)
    denom = jnp.sum(e, axis=-1, keepdims=True)
    out_ref[...] = (e * pl.reciprocal(denom, approx=True)).astype(out_ref.dtype)


def actor_forward(x, params, *, block_b=256):
    """x: (B, obs_dim) float32 -> (B, n_actions) float32 softmax probabilities."""
    w1, b1, w2, b2, w3, b3 = params
    B, obs_dim = x.shape
    H = w1.shape[1]
    A = w3.shape[1]
    A_pad = _round_up(A, LANE)

    # Weights -> bf16 (MXU-native rate); pad the action dim to a full lane tile.
    w1b = w1.astype(jnp.bfloat16)
    w2b = w2.astype(jnp.bfloat16)
    w3b = jnp.zeros((H, A_pad), jnp.bfloat16).at[:, :A].set(w3.astype(jnp.bfloat16))
    b3p = jnp.zeros((1, A_pad), jnp.float32).at[:, :A].set(b3)

    # Batch tiling: biggest tile that is a multiple of the 8-row sublane, capped at block_b.
    tb = min(block_b, _round_up(B, SUBLANE))
    b_pad = _round_up(B, tb)
    x_pad = x if b_pad == B else jnp.pad(x, ((0, b_pad - B), (0, 0)))

    resident = lambda shape: pl.BlockSpec(shape, lambda i: (0, 0))  # stays in VMEM across grid

    out = pl.pallas_call(
        functools.partial(actor_kernel, n_actions=A),
        out_shape=jax.ShapeDtypeStruct((b_pad, A_pad), jnp.float32),
        grid=(b_pad // tb,),
        in_specs=[
            pl.BlockSpec((tb, obs_dim), lambda i: (i, 0)),   # x tile
            resident((obs_dim, H)),
            resident((1, H)),
            resident((H, H)),
            resident((1, H)),
            resident((H, A_pad)),
            resident((1, A_pad)),
        ],
        out_specs=pl.BlockSpec((tb, A_pad), lambda i: (i, 0)),
        compiler_params=pltpu.CompilerParams(
            dimension_semantics=("parallel",),
        ),
    )(x_pad, w1b, b1, w2b, b2, w3b, b3p)

    return out[:B, :A]


def init_params(key, obs_dim, hidden, n_actions):
    """Deterministic PyTorch-style init: U(-1/sqrt(fan_in), 1/sqrt(fan_in))."""
    ks = jax.random.split(key, 6)

    def lin(kw, kb, fan_in, fan_out):
        bound = 1.0 / jnp.sqrt(jnp.float32(fan_in))
        w = jax.random.uniform(kw, (fan_in, fan_out), jnp.float32, -bound, bound)
        b = jax.random.uniform(kb, (1, fan_out), jnp.float32, -bound, bound)
        return w, b

    w1, b1 = lin(ks[0], ks[1], obs_dim, hidden)
    w2, b2 = lin(ks[2], ks[3], hidden, hidden)
    w3, b3 = lin(ks[4], ks[5], hidden, n_actions)
    return (w1, b1, w2, b2, w3, b3)


def actor_ref_f32(x, params):
    """Pure-JAX exact f32 reference (matches the PyTorch module's math)."""
    w1, b1, w2, b2, w3, b3 = params
    h = jax.nn.gelu(x @ w1 + b1, approximate=False)
    h = jax.nn.gelu(h @ w2 + b2, approximate=False)
    return jax.nn.softmax(h @ w3 + b3, axis=-1)


def actor_ref_bf16(x, params):
    """Pure-JAX reference mimicking the kernel's bf16-operand / f32-accum matmuls."""
    w1, b1, w2, b2, w3, b3 = params

    def mm(a, w):
        return jnp.dot(a.astype(jnp.bfloat16), w.astype(jnp.bfloat16),
                       preferred_element_type=jnp.float32)

    h = jax.nn.gelu(mm(x, w1) + b1, approximate=False)
    h = jax.nn.gelu(mm(h, w2) + b2, approximate=False)
    return jax.nn.softmax(mm(h, w3) + b3, axis=-1)


if __name__ == "__main__":
    key = jax.random.PRNGKey(0)
    k_x, k_p, k_x2 = jax.random.split(key, 3)

    B, OBS, HIDDEN, ACTIONS = 8, 8, 128, 4  # small env: obs_dim=8, 4 discrete actions
    x = jax.random.normal(k_x, (B, OBS), jnp.float32)
    params = init_params(k_p, OBS, HIDDEN, ACTIONS)

    out = jax.block_until_ready(actor_forward(x, params))
    assert out.shape == (B, ACTIONS)
    assert jnp.allclose(jnp.sum(out, axis=-1), 1.0, atol=5e-3)
    # Tight check vs. a reference that uses the same bf16-operand matmuls.
    assert jnp.allclose(out, actor_ref_bf16(x, params), atol=2e-3, rtol=2e-3)
    # Loose check vs. the exact f32 PyTorch-equivalent reference (bf16-weight delta).
    assert jnp.allclose(out, actor_ref_f32(x, params), atol=5e-2, rtol=5e-2)

    # Larger batch: exercises the batch grid (2 tiles of 256) and row padding.
    B2 = 300
    x2 = jax.random.normal(k_x2, (B2, OBS), jnp.float32)
    out2 = jax.block_until_ready(actor_forward(x2, params))
    assert out2.shape == (B2, ACTIONS)
    assert jnp.allclose(jnp.sum(out2, axis=-1), 1.0, atol=5e-3)
    assert jnp.allclose(out2, actor_ref_bf16(x2, params), atol=2e-3, rtol=2e-3)

    print("KERNEL_OK")
</pallas_src>

<mosaic_0001>
module attributes {stable_mosaic.version = 11 : i64} {
  func.func @actor_kernel(%arg0: i32, %arg1: memref<8x8xf32, #tpu.memory_space<vmem>>, %arg2: memref<8x128xbf16, #tpu.memory_space<vmem>>, %arg3: memref<1x128xf32, #tpu.memory_space<vmem>>, %arg4: memref<128x128xbf16, #tpu.memory_space<vmem>>, %arg5: memref<1x128xf32, #tpu.memory_space<vmem>>, %arg6: memref<128x128xbf16, #tpu.memory_space<vmem>>, %arg7: memref<1x128xf32, #tpu.memory_space<vmem>>, %arg8: memref<8x128xf32, #tpu.memory_space<vmem>>) attributes {dimension_semantics = [#tpu.dimension_semantics<parallel>], iteration_bounds = array<i64: 1>, scalar_prefetch = 0 : i64, scratch_operands = 0 : i64, tpu.core_type = #tpu.core_type<tc>, window_params = [{transform_indices = @transform_0, window_bounds = array<i64: 8, 8>}, {pipeline_mode = #tpu.pipeline_mode<synchronous>, transform_indices = @transform_1, window_bounds = array<i64: 8, 128>}, {pipeline_mode = #tpu.pipeline_mode<synchronous>, transform_indices = @transform_2, window_bounds = array<i64: 1, 128>}, {pipeline_mode = #tpu.pipeline_mode<synchronous>, transform_indices = @transform_3, window_bounds = array<i64: 128, 128>}, {pipeline_mode = #tpu.pipeline_mode<synchronous>, transform_indices = @transform_4, window_bounds = array<i64: 1, 128>}, {pipeline_mode = #tpu.pipeline_mode<synchronous>, transform_indices = @transform_5, window_bounds = array<i64: 128, 128>}, {pipeline_mode = #tpu.pipeline_mode<synchronous>, transform_indices = @transform_6, window_bounds = array<i64: 1, 128>}, {transform_indices = @transform_7, window_bounds = array<i64: 8, 128>}]} {
    %c0 = arith.constant 0 : index
    %c0_0 = arith.constant 0 : index
    %0 = vector.load %arg1[%c0, %c0_0] : memref<8x8xf32, #tpu.memory_space<vmem>>, vector<8x8xf32>
    %1 = arith.truncf %0 : vector<8x8xf32> to vector<8x8xbf16>
    %c0_1 = arith.constant 0 : index
    %c0_2 = arith.constant 0 : index
    %2 = vector.load %arg2[%c0_1, %c0_2] : memref<8x128xbf16, #tpu.memory_space<vmem>>, vector<8x128xbf16>
    %cst = arith.constant dense<0.000000e+00> : vector<8x128xf32>
    %3 = tpu.matmul %1, %2, %cst {dimension_numbers = #tpu.dot_dimension_numbers<[1], [0], [0], [1], [0, 0, 1, 1], [], []>} : vector<8x8xbf16>, vector<8x128xbf16>, vector<8x128xf32> -> vector<8x128xf32>
    %c0_3 = arith.constant 0 : index
    %c0_4 = arith.constant 0 : index
    %4 = vector.load %arg3[%c0_3, %c0_4] : memref<1x128xf32, #tpu.memory_space<vmem>>, vector<1x128xf32>
    %5 = vector.broadcast %4 : vector<1x128xf32> to vector<8x128xf32>
    %6 = arith.addf %3, %5 : vector<8x128xf32>
    %cst_5 = arith.constant 5.000000e-01 : f32
    %7 = vector.broadcast %cst_5 : f32 to vector<8x128xf32>
    %8 = arith.mulf %7, %6 : vector<8x128xf32>
    %cst_6 = arith.constant 2.000000e+00 : f32
    %9 = math.sqrt %cst_6 : f32
    %cst_7 = arith.constant 1.000000e+00 : f32
    %10 = arith.divf %cst_7, %9 : f32
    %11 = vector.broadcast %10 : f32 to vector<8x128xf32>
    %12 = arith.mulf %6, %11 : vector<8x128xf32>
    %13 = math.erf %12 : vector<8x128xf32>
    %cst_8 = arith.constant 1.000000e+00 : f32
    %14 = vector.broadcast %cst_8 : f32 to vector<8x128xf32>
    %15 = arith.addf %14, %13 : vector<8x128xf32>
    %16 = arith.mulf %8, %15 : vector<8x128xf32>
    %17 = arith.truncf %16 : vector<8x128xf32> to vector<8x128xbf16>
    %c0_9 = arith.constant 0 : index
    %c0_10 = arith.constant 0 : index
    %18 = vector.load %arg4[%c0_9, %c0_10] : memref<128x128xbf16, #tpu.memory_space<vmem>>, vector<128x128xbf16>
    %cst_11 = arith.constant dense<0.000000e+00> : vector<8x128xf32>
    %19 = tpu.matmul %17, %18, %cst_11 {dimension_numbers = #tpu.dot_dimension_numbers<[1], [0], [0], [1], [0, 0, 1, 1], [], []>} : vector<8x128xbf16>, vector<128x128xbf16>, vector<8x128xf32> -> vector<8x128xf32>
    %c0_12 = arith.constant 0 : index
    %c0_13 = arith.constant 0 : index
    %20 = vector.load %arg5[%c0_12, %c0_13] : memref<1x128xf32, #tpu.memory_space<vmem>>, vector<1x128xf32>
    %21 = vector.broadcast %20 : vector<1x128xf32> to vector<8x128xf32>
    %22 = arith.addf %19, %21 : vector<8x128xf32>
    %cst_14 = arith.constant 5.000000e-01 : f32
    %23 = vector.broadcast %cst_14 : f32 to vector<8x128xf32>
    %24 = arith.mulf %23, %22 : vector<8x128xf32>
    %cst_15 = arith.constant 2.000000e+00 : f32
    %25 = math.sqrt %cst_15 : f32
    %cst_16 = arith.constant 1.000000e+00 : f32
    %26 = arith.divf %cst_16, %25 : f32
    %27 = vector.broadcast %26 : f32 to vector<8x128xf32>
    %28 = arith.mulf %22, %27 : vector<8x128xf32>
    %29 = math.erf %28 : vector<8x128xf32>
    %cst_17 = arith.constant 1.000000e+00 : f32
    %30 = vector.broadcast %cst_17 : f32 to vector<8x128xf32>
    %31 = arith.addf %30, %29 : vector<8x128xf32>
    %32 = arith.mulf %24, %31 : vector<8x128xf32>
    %33 = arith.truncf %32 : vector<8x128xf32> to vector<8x128xbf16>
    %c0_18 = arith.constant 0 : index
    %c0_19 = arith.constant 0 : index
    %34 = vector.load %arg6[%c0_18, %c0_19] : memref<128x128xbf16, #tpu.memory_space<vmem>>, vector<128x128xbf16>
    %cst_20 = arith.constant dense<0.000000e+00> : vector<8x128xf32>
    %35 = tpu.matmul %33, %34, %cst_20 {dimension_numbers = #tpu.dot_dimension_numbers<[1], [0], [0], [1], [0, 0, 1, 1], [], []>} : vector<8x128xbf16>, vector<128x128xbf16>, vector<8x128xf32> -> vector<8x128xf32>
    %c0_21 = arith.constant 0 : index
    %c0_22 = arith.constant 0 : index
    %36 = vector.load %arg7[%c0_21, %c0_22] : memref<1x128xf32, #tpu.memory_space<vmem>>, vector<1x128xf32>
    %37 = vector.broadcast %36 : vector<1x128xf32> to vector<8x128xf32>
    %38 = arith.addf %35, %37 : vector<8x128xf32>
    %39 = tpu.iota {dimensions = array<i32: 1>} : vector<8x128xi32>
    %c4_i32 = arith.constant 4 : i32
    %40 = vector.broadcast %c4_i32 : i32 to vector<8x128xi32>
    %41 = arith.cmpi slt, %39, %40 : vector<8x128xi32>
    %cst_23 = arith.constant -1.000000e+30 : f32
    %42 = vector.broadcast %cst_23 : f32 to vector<8x128xf32>
    %43 = arith.select %41, %38, %42 : vector<8x128xi1>, vector<8x128xf32>
    %cst_24 = arith.constant dense<0xFF800000> : vector<8xf32>
    %44 = vector.multi_reduction <maximumf>, %43, %cst_24 [1] : vector<8x128xf32> to vector<8xf32>
    %45 = vector.shape_cast %44 : vector<8xf32> to vector<8x1xf32>
    %46 = vector.broadcast %45 : vector<8x1xf32> to vector<8x128xf32>
    %47 = arith.subf %43, %46 : vector<8x128xf32>
    %48 = math.exp %47 : vector<8x128xf32>
    %cst_25 = arith.constant dense<0.000000e+00> : vector<8xf32>
    %49 = vector.multi_reduction <add>, %48, %cst_25 [1] : vector<8x128xf32> to vector<8xf32>
    %50 = vector.shape_cast %49 : vector<8xf32> to vector<8x1xf32>
    %51 = tpu.reciprocal %50 {approx = true} : vector<8x1xf32> -> vector<8x1xf32>
    %52 = vector.broadcast %51 : vector<8x1xf32> to vector<8x128xf32>
    %53 = arith.mulf %48, %52 : vector<8x128xf32>
    %c0_26 = arith.constant 0 : index
    %c0_27 = arith.constant 0 : index
    %54 = vector.load %arg8[%c0_26, %c0_27] : memref<8x128xf32, #tpu.memory_space<vmem>>, vector<8x128xf32>
    tpu.vector_store %arg8[%c0_26, %c0_27], %53 {strides = array<i32>} : memref<8x128xf32, #tpu.memory_space<vmem>>, vector<8x128xf32>,
    return
  }
  func.func @transform_0(%arg0: i32) -> (i32, i32) {
    %c0_i32 = arith.constant 0 : i32
    %c0_i32_0 = arith.constant 0 : i32
    return %arg0, %c0_i32 : i32, i32
  }
  func.func @transform_1(%arg0: i32) -> (i32, i32) {
    %c0_i32 = arith.constant 0 : i32
    %c0_i32_0 = arith.constant 0 : i32
    %c0_i32_1 = arith.constant 0 : i32
    return %c0_i32, %c0_i32_0 : i32, i32
  }
  func.func @transform_2(%arg0: i32) -> (i32, i32) {
    %c0_i32 = arith.constant 0 : i32
    %c0_i32_0 = arith.constant 0 : i32
    %c0_i32_1 = arith.constant 0 : i32
    return %c0_i32, %c0_i32_0 : i32, i32
  }
  func.func @transform_3(%arg0: i32) -> (i32, i32) {
    %c0_i32 = arith.constant 0 : i32
    %c0_i32_0 = arith.constant 0 : i32
    %c0_i32_1 = arith.constant 0 : i32
    return %c0_i32, %c0_i32_0 : i32, i32
  }
  func.func @transform_4(%arg0: i32) -> (i32, i32) {
    %c0_i32 = arith.constant 0 : i32
    %c0_i32_0 = arith.constant 0 : i32
    %c0_i32_1 = arith.constant 0 : i32
    return %c0_i32, %c0_i32_0 : i32, i32
  }
  func.func @transform_5(%arg0: i32) -> (i32, i32) {
    %c0_i32 = arith.constant 0 : i32
    %c0_i32_0 = arith.constant 0 : i32
    %c0_i32_1 = arith.constant 0 : i32
    return %c0_i32, %c0_i32_0 : i32, i32
  }
  func.func @transform_6(%arg0: i32) -> (i32, i32) {
    %c0_i32 = arith.constant 0 : i32
    %c0_i32_0 = arith.constant 0 : i32
    %c0_i32_1 = arith.constant 0 : i32
    return %c0_i32, %c0_i32_0 : i32, i32
  }
  func.func @transform_7(%arg0: i32) -> (i32, i32) {
    %c0_i32 = arith.constant 0 : i32
    %c0_i32_0 = arith.constant 0 : i32
    return %arg0, %c0_i32 : i32, i32
  }
}

</mosaic_0001>

<bundles_post_ra>
// kernel: tpu_custom_call.1
= control target key start
LH: loop header
LB: loop body
LE: loop exit
PB: predicated region body
PF: predicated region fallthrough
CT: control target
= control target key end

     0   :  { %12 = vsyncpa [#allocation3], 0  ;;  %s780_s0 = inlined_call_operand.hbm [shape: f32[8,8], index: 0, kind: input, shape index: {}]   ;;  %s781_s1 = inlined_call_operand.hbm [shape: bf16[8,128], index: 1, kind: input, shape index: {}]   ;;  %s782_s2 = inlined_call_operand.vmem [shape: f32[1,128], index: 2, kind: input, shape index: {}]   ;;  %s783_s3 = inlined_call_operand.hbm [shape: bf16[128,128], index: 3, kind: input, shape index: {}]   ;;  %s784_s4 = inlined_call_operand.vmem [shape: f32[1,128], index: 4, kind: input, shape index: {}]   ;;  %s785_s5 = inlined_call_operand.hbm [shape: bf16[128,128], index: 5, kind: input, shape index: {}]   ;;  %s786_s6 = inlined_call_operand.vmem [shape: f32[1,128], index: 6, kind: input, shape index: {}]   ;;  %s787_s7 = inlined_call_operand.hbm [shape: f32[8,128], index: 7, kind: output, shape index: {}]  }
   0x1   :  { %13 = vsyncpa [#allocation6], 0 }
   0x2   :  { %14 = vsyncpa [#allocation9], 0 }
   0x3   :  { %15 = vsyncpa [#allocation4], 0  ;;  %s639_s24 = smov [#allocation5]   ;;  %s640_s26 = smov [#allocation2]  }
   0x4   :  { %s32_s25 = sshll.u32 %s639_s24, 4  ;;  %s22_s27 = sshll.u32 %s640_s26, 4  ;;  %s33_s25 = int_to_ptr.vmem [resolvable:$true] %s32_s25  ;;  %s23_s27 = int_to_ptr.vmem [resolvable:$true] %s22_s27 }
   0x5   :  { %s521_s30 = scalar_lea.hbm %s781_s1, 64 }
   0x6   :  { %p522_p0 = scmp.ne.s32.totalorder %s781_s1, %s521_s30  ;;  %p525_p1 = scmp.lt.u32.totalorder %s521_s30, %s781_s1 }
   0x8   :  { %p527_p2 = pnand %p525_p1, %p522_p0 }
   0xa   :  { %530 = shalt.err (!%p527_p2)
}
   0xb   :  { %s531_s12 = scalar_lea.vmem %s33_s25, 64  ;;  %p536_p4 = scmp.lt.s32.totalorder %s33_s25, %s33_s25 }
   0xc   :  { %p532_p3 = scmp.ne.s32.totalorder %s33_s25, %s531_s12  ;;  %p537_p5 = scmp.lt.s32.totalorder %s531_s12, %s531_s12 }
   0xe   :  { %p538_p6 = por %p537_p5, %p536_p4 }
  0x10   :  { %p539_p7 = pnand %p538_p6, %p532_p3 }
  0x12   :  { %542 = shalt.err (!%p539_p7)
}
  0x13   :  { %35 = dma.hbm_to_vmem [thread:$0]  %s781_s1, 64, %s33_s25, [#allocation6]  }
  0x14   :  { %s543_s17 = scalar_lea.hbm %s780_s0, 128 }
  0x15   :  { %p544_p8 = scmp.ne.s32.totalorder %s780_s0, %s543_s17  ;;  %p547_p9 = scmp.lt.u32.totalorder %s543_s17, %s780_s0 }
  0x17   :  { %p549_p10 = pnand %p547_p9, %p544_p8 }
  0x19   :  { %552 = shalt.err (!%p549_p10)
}
  0x1a   :  { %s553_s22 = scalar_lea.vmem %s23_s27, 128  ;;  %p558_p12 = scmp.lt.s32.totalorder %s23_s27, %s23_s27 }
  0x1b   :  { %p554_p11 = scmp.ne.s32.totalorder %s23_s27, %s553_s22  ;;  %p559_p13 = scmp.lt.s32.totalorder %s553_s22, %s553_s22 }
  0x1d   :  { %p560_p0 = por %p559_p13, %p558_p12 }
  0x1f   :  { %p561_p1 = pnand %p560_p0, %p554_p11 }
  0x21   :  { %564 = shalt.err (!%p561_p1)
}
  0x22   :  { %25 = dma.hbm_to_vmem [thread:$0]  %s780_s0, 128, %s23_s27, [#allocation3]  }
  0x23   :  { %s641_s24 = smov [#allocation7]   ;;  %s565_s29 = scalar_lea.hbm %s783_s3, 1024 }
  0x24   :  { %s43_s25 = sshll.u32 %s641_s24, 4  ;;  %p566_p2 = scmp.ne.s32.totalorder %s783_s3, %s565_s29  ;;  %s44_s25 = int_to_ptr.vmem [resolvable:$true] %s43_s25 }
  0x25   :  { %p569_p3 = scmp.lt.u32.totalorder %s565_s29, %s783_s3 }
  0x27   :  { %p571_p4 = pnand %p569_p3, %p566_p2 }
  0x29   :  { %574 = shalt.err (!%p571_p4)
}
  0x2a   :  { %s575_s11 = scalar_lea.vmem %s44_s25, 1024  ;;  %p580_p6 = scmp.lt.s32.totalorder %s44_s25, %s44_s25 }
  0x2b   :  { %p576_p5 = scmp.ne.s32.totalorder %s44_s25, %s575_s11  ;;  %p581_p7 = scmp.lt.s32.totalorder %s575_s11, %s575_s11 }
  0x2d   :  { %p582_p8 = por %p581_p7, %p580_p6 }
  0x2f   :  { %p583_p9 = pnand %p582_p8, %p576_p5 }
  0x31   :  { %586 = shalt.err (!%p583_p9)
}
  0x32   :  { %s642_s0 = smov 64   ;;  %s643_s27 = smov 4  }
  0x33   :  { %49 = dma.hbm_to_vmem [thread:$0]  %s783_s3, 1024, %s44_s25, [#allocation6], %s642_s0, %s642_s0, %s643_s27  }
  0x34   :  { %s644_s14 = smov [#allocation8]   ;;  %s587_s18 = scalar_lea.hbm %s785_s5, 1024 }
  0x35   :  { %s57_s15 = sshll.u32 %s644_s14, 4  ;;  %p588_p10 = scmp.ne.s32.totalorder %s785_s5, %s587_s18  ;;  %s58_s15 = int_to_ptr.vmem [resolvable:$true] %s57_s15 }
  0x36   :  { %p591_p11 = scmp.lt.u32.totalorder %s587_s18, %s785_s5 }
  0x38   :  { %p593_p12 = pnand %p591_p11, %p588_p10 }
  0x3a   :  { %596 = shalt.err (!%p593_p12)
}
  0x3b   :  { %s597_s1 = scalar_lea.vmem %s58_s15, 1024  ;;  %p602_p0 = scmp.lt.s32.totalorder %s58_s15, %s58_s15 }
  0x3c   :  { %p598_p13 = scmp.ne.s32.totalorder %s58_s15, %s597_s1  ;;  %p603_p1 = scmp.lt.s32.totalorder %s597_s1, %s597_s1 }
  0x3e   :  { %p604_p2 = por %p603_p1, %p602_p0 }
  0x40   :  { %p605_p3 = pnand %p604_p2, %p598_p13 }
  0x42   :  { %608 = shalt.err (!%p605_p3)
}
  0x43   :  { %63 = dma.hbm_to_vmem [thread:$0]  %s785_s5, 1024, %s58_s15, [#allocation9], %s642_s0, %s642_s0, %s643_s27  }
  0x44   :  { %631 = dma.done.wait [#allocation3], 128  }
  0x45   :  { %632 = vsyncadd [#allocation3], 4294967168 }
  0x46   :  { %633 = dma.done.wait [#allocation6], 1088  }
  0x47   :  { %634 = vsyncadd [#allocation6], 4294966208 }
  0x48   :  { %635 = dma.done.wait [#allocation9], 1024  }
  0x49   :  { %636 = vsyncadd [#allocation9], 4294966272  ;;  %v645_v0 = vmov 0.0   ;;  %vm646_vm0 = vmmov 0   ;;  %vm93_vm1 = vcmask 1043456   ;;  %v79_v2 = vld [vmem:[#allocation2] sm:$0xff]  ;;  %v371_v45 = vlaneseq }
  0x4a   :  { %442 = vmatprep.subr.bf16.mxu0 %v645_v0  ;;  %444 = vmatprep.mubr.msk.bf16.mxu0 %vm646_vm0, %v645_v0  ;;  %v81_v1 = vld [vmem:[#allocation5] sm:$0xf]  ;;  %v80_v4 = vpack.c.bf16 %v79_v2, %v79_v2  ;;  %v497_v5 = vld [vmem:[#allocation7] sm:$0xff]   ;;  %vm89_vm2 = vcmask 64512   ;;  %v498_v6 = vld [vmem:[#allocation7 + $0x8] sm:$0xff]  }
  0x4b   :  { %448 = vmatprep.subr.bf16.mxu1 %v645_v0  ;;  %464 = vmatprep.mubr.msk.bf16.mxu1 %vm646_vm0, %v645_v0  ;;  %v95_v3 = vsel %vm93_vm1, %v81_v1, 0  ;;  %v499_v7 = vld [vmem:[#allocation7 + $0x10] sm:$0xff]   ;;  %v500_v8 = vld [vmem:[#allocation7 + $0x18] sm:$0xff]   ;;  %v501_v9 = vld [vmem:[#allocation7 + $0x20] sm:$0xff]   ;;  %v372_v46 = vand.u32 127, %v371_v45 }
  0x4c   :  { %443 = vmatpush3.bf16.msra.mxu0 %v95_v3  ;;  %449 = vmatpush3.bf16.msra.mxu1 %v497_v5  ;;  %v502_v10 = vld [vmem:[#allocation7 + $0x28] sm:$0xff]   ;;  %v503_v11 = vld [vmem:[#allocation7 + $0x30] sm:$0xff]   ;;  %v504_v12 = vld [vmem:[#allocation7 + $0x38] sm:$0xff]  }
  0x4d   :  { %468 = vmatprep.subr.bf16.mxu0 %v645_v0  ;;  %450 = vmatprep.subr.bf16.mxu1 %v645_v0  ;;  %v505_v13 = vld [vmem:[#allocation8] sm:$0xff]   ;;  %v506_v14 = vld [vmem:[#allocation8 + $0x8] sm:$0xff]   ;;  %v507_v15 = vld [vmem:[#allocation8 + $0x10] sm:$0xff]   ;;  %vm373_vm3 = vcmp.lt.s32.totalorder %v372_v46, 4 }
  0x4e   :  { %v402_v16 = vld [vmem:[%s782_s2] ss:$0 sm:$0xff]  ;;  %v508_v28 = vld [vmem:[#allocation8 + $0x18] sm:$0xff]   ;;  %v509_v29 = vld [vmem:[#allocation8 + $0x20] sm:$0xff]  }
  0x4f   :  { %445 = vmatmul.mubr.msk.bf16.vlgmr.msra.gmra.mrb[0].mxu0 %vm89_vm2, %v80_v4  ;;  %v510_v30 = vld [vmem:[#allocation8 + $0x28] sm:$0xff]   ;;  %v511_v31 = vld [vmem:[#allocation8 + $0x30] sm:$0xff]   ;;  %v512_v32 = vld [vmem:[#allocation8 + $0x38] sm:$0xff]  }
  0x50   :  { %484 = vmatprep.mubr.msk.bf16.mxu0 %vm646_vm0, %v645_v0  ;;  %451 = vmatpush3.bf16.msra.mxu1 %v498_v6  ;;  %v404_v33 = vld [vmem:[%s784_s4] ss:$0 sm:$0xff]  ;;  %s647_s4 = smov [#allocation10]  }
  0x51   :  { %452 = vmatprep.subr.bf16.mxu1 %v645_v0  ;;  %469 = vmatpush3.bf16.msra.mxu0 %v505_v13  ;;  %v413_v47 = vld [vmem:[%s786_s6] ss:$0 sm:$0xff]  ;;  %s391_s29 = sshll.u32 %s647_s4, 4  ;;  %s392_s29 = int_to_ptr.vmem [resolvable:$true] %s391_s29 }
  0x52   :  { %470 = vmatprep.subr.bf16.mxu0 %v645_v0  ;;  %s609_s6 = scalar_lea.vmem %s392_s29, 128  ;;  %p614_p5 = scmp.lt.s32.totalorder %s392_s29, %s392_s29 }
  0x53   :  { %p610_p4 = scmp.ne.s32.totalorder %s392_s29, %s609_s6  ;;  %p615_p6 = scmp.lt.s32.totalorder %s609_s6, %s609_s6 }
  0x54   :  { %453 = vmatpush3.bf16.msra.mxu1 %v499_v7 }
  0x55   :  { %454 = vmatprep.subr.bf16.mxu1 %v645_v0  ;;  %471 = vmatpush3.bf16.msra.mxu0 %v506_v14  ;;  %p616_p7 = por %p615_p6, %p614_p5 }
  0x56   :  { %472 = vmatprep.subr.bf16.mxu0 %v645_v0 }
  0x57   :  { %p617_p8 = pnand %p616_p7, %p610_p4 }
  0x58   :  { %455 = vmatpush3.bf16.msra.mxu1 %v500_v8 }
  0x59   :  { %456 = vmatprep.subr.bf16.mxu1 %v645_v0  ;;  %473 = vmatpush3.bf16.msra.mxu0 %v507_v15 }
  0x5a   :  { %474 = vmatprep.subr.bf16.mxu0 %v645_v0 }
  0x5c   :  { %457 = vmatpush3.bf16.msra.mxu1 %v501_v9 }
  0x5d   :  { %458 = vmatprep.subr.bf16.mxu1 %v645_v0  ;;  %475 = vmatpush3.bf16.msra.mxu0 %v508_v28 }
  0x5e   :  { %476 = vmatprep.subr.bf16.mxu0 %v645_v0 }
  0x60   :  { %459 = vmatpush3.bf16.msra.mxu1 %v502_v10 }
  0x61   :  { %460 = vmatprep.subr.bf16.mxu1 %v645_v0  ;;  %477 = vmatpush3.bf16.msra.mxu0 %v509_v29 }
  0x62   :  { %478 = vmatprep.subr.bf16.mxu0 %v645_v0 }
  0x64   :  { %461 = vmatpush3.bf16.msra.mxu1 %v503_v11 }
  0x65   :  { %462 = vmatprep.subr.bf16.mxu1 %v645_v0  ;;  %479 = vmatpush3.bf16.msra.mxu0 %v510_v30 }
  0x66   :  { %480 = vmatprep.subr.bf16.mxu0 %v645_v0 }
  0x68   :  { %463 = vmatpush3.bf16.msra.mxu1 %v504_v12 }
  0x69   :  { %481 = vmatpush3.bf16.msra.mxu0 %v511_v31 }
  0x6a   :  { %482 = vmatprep.subr.bf16.mxu0 %v645_v0 }
  0x6d   :  { %483 = vmatpush3.bf16.msra.mxu0 %v512_v32 }
 0x122   :  { %v131_v17 = vpop.f32.mrb[0].mxu0 }
 0x123   :  { %v132_v18 = vadd.f32 %v402_v16, %v131_v17  ;;  %v446_v19 = vpop.f32.mrb[1].mxu0 }
 0x124   :  { %v134_v20 = vpop.f32.mrb[2].mxu0 }
 0x125   :  { %v138_v21 = vmul.f32 0.70710677, %v132_v18  ;;  %v447_v22 = vpop.f32.mrb[3].mxu0  ;;  %v137_v24 = vmul.f32 0.5, %v132_v18 }
 0x127   :  { %513 = verf.f32 %v138_v21 }
 0x131   :  { %v514_v23 = vpop.eup %513 }
 0x132   :  { %v140_v25 = vadd.f32 1.0, %v514_v23 }
 0x134   :  { %v141_v26 = vmul.f32 %v140_v25, %v137_v24 }
 0x136   :  { %v142_v27 = vpack.c.bf16 %v141_v26, %v141_v26 }
 0x138   :  { %465 = vmatmul.mubr.bf16.vlgmr.msra.gmra.mrb[0].mxu1 %v142_v27 }
 0x20b   :  { %v248_v34 = vpop.f32.mrb[0].mxu1 }
 0x20c   :  { %v249_v35 = vadd.f32 %v404_v33, %v248_v34  ;;  %v466_v36 = vpop.f32.mrb[1].mxu1 }
 0x20d   :  { %v251_v37 = vpop.f32.mrb[2].mxu1 }
 0x20e   :  { %v255_v38 = vmul.f32 0.70710677, %v249_v35  ;;  %v467_v39 = vpop.f32.mrb[3].mxu1  ;;  %v254_v41 = vmul.f32 0.5, %v249_v35 }
 0x210   :  { %515 = verf.f32 %v255_v38 }
 0x21a   :  { %v516_v40 = vpop.eup %515 }
 0x21b   :  { %v257_v42 = vadd.f32 1.0, %v516_v40 }
 0x21d   :  { %v258_v43 = vmul.f32 %v257_v42, %v254_v41 }
 0x21f   :  { %v259_v44 = vpack.c.bf16 %v258_v43, %v258_v43 }
 0x221   :  { %485 = vmatmul.mubr.bf16.vlgmr.msra.gmra.mrb[4].mxu0 %v259_v44 }
 0x2f4   :  { %v365_v48 = vpop.f32.mrb[4].mxu0 }
 0x2f5   :  { %v366_v49 = vadd.f32 %v413_v47, %v365_v48  ;;  %v486_v50 = vpop.f32.mrb[5].mxu0 }
 0x2f6   :  { %v368_v51 = vpop.f32.mrb[6].mxu0 }
 0x2f7   :  { %v487_v52 = vpop.f32.mrb[7].mxu0  ;;  %v374_v53 = vsel %vm373_vm3, %v366_v49, -1e+30 }
 0x2f8   :  { %375 = vmax.xlane.f32.xlu0 %v374_v53 }
 0x385   :  { %v376_v54 = vpop.xlane.xlu0 %375 }
 0x386   :  { %v377_v55 = vsub.f32 %v374_v53, %v376_v54 }
 0x388   :  { %v378_v56 = vmul.f32 1.442695, %v377_v55 }
 0x38a   :  { %517 = vpow2.f32 %v378_v56 }
 0x394   :  { %v518_v57 = vpop.eup %517 }
 0x395   :  { %380 = vadd.xlane.f32.xlu0 %v518_v57 }
 0x422   :  { %v381_v58 = vpop.xlane.xlu0 %380 }
 0x423   :  { %519 = vrcp.f32 %v381_v58 }
 0x42d   :  { %v520_v59 = vpop.eup %519 }
 0x42e   :  { %v383_v60 = vmul.f32 %v520_v59, %v518_v57 }
 0x430   :  { %384 = vst [vmem:[#allocation10] sm:$0xff] %v383_v60 }
 0x431   :  { %620 = shalt.err (!%p617_p8)
}
 0x432   :  { %s621_s9 = scalar_lea.hbm %s787_s7, 128 }
 0x433   :  { %p622_p9 = scmp.ne.s32.totalorder %s787_s7, %s621_s9  ;;  %p625_p10 = scmp.lt.u32.totalorder %s621_s9, %s787_s7 }
 0x435   :  { %p627_p11 = pnand %p625_p10, %p622_p9 }
 0x437   :  { %630 = shalt.err (!%p627_p11)
}
 0x438   :  { %394 = dma.vmem_to_hbm [thread:$0]  %s392_s29, 128, %s787_s7, [#allocation4]  }
 0x439   :  { %637 = dma.done.wait [#allocation4], 128  }
 0x43a   :  { %638 = vsyncadd [#allocation4], 4294967168 }
 0x43b   :  { %398 = vsyncpa [#allocation3], 1 }
 0x43c   :  { %399 = vsyncpa [#allocation6], 1 }
 0x43d   :  { %400 = vsyncpa [#allocation9], 1 }
 0x43e   :  { %401 = vsyncpa [#allocation4], 1 }

</bundles_post_ra>
